<compile_context>
chip_gen: v5e
topology: v5e:2x2
jax: 0.10.0
libtpu: 0.0.40
codegen_flags: <defaults>
</compile_context>

<pallas_src>
import functools

import jax
import jax.numpy as jnp
from jax.experimental import pallas as pl
from jax.experimental.pallas import tpu as pltpu


def ffn_kernel(x_ref, w1_ref, b1_ref, w2_ref, b2_ref, gamma_ref, beta_ref,
               o_ref, *, epsilon, feat, feat_pad):
    x = x_ref[...].astype(jnp.float32)                       # (TM, Dp)

    # Linear 1 + ReLU  (MXU matmul, f32 accumulate)
    h = jnp.dot(x, w1_ref[...], preferred_element_type=jnp.float32) + b1_ref[...]
    h = jnp.maximum(h, 0.0)

    # Linear 2 + residual.  Padded lanes of x / W2-cols / b2 are zero, so the
    # padded lanes of y are exactly zero.
    y = jnp.dot(h, w2_ref[...], preferred_element_type=jnp.float32) + b2_ref[...]
    y = y + x

    # Layer norm over the *real* `feat` channels (PyTorch semantics: unbiased
    # std, eps added to std).  Padded lanes of y are zero, so a full-lane sum
    # divided by `feat` is the correct mean.
    mean = jnp.sum(y, axis=-1, keepdims=True) * (1.0 / feat)
    diff = y - mean
    if feat_pad != feat:
        # Zero the padded lanes so they do not contribute to the variance.
        lane = jax.lax.broadcasted_iota(jnp.int32, (1, feat_pad), 1)
        diff = jnp.where(lane < feat, diff, 0.0)
    var_unbiased = jnp.sum(diff * diff, axis=-1, keepdims=True) * (1.0 / (feat - 1))
    std = jnp.sqrt(var_unbiased)
    inv = pl.reciprocal(std + epsilon, approx=False)          # EUP, exact
    out = gamma_ref[...] * diff * inv + beta_ref[...]         # padded lanes -> 0

    o_ref[...] = out.astype(o_ref.dtype)


def _round_up(a, m):
    return (a + m - 1) // m * m


def feedforward_pallas(x, w1, b1, w2, b2, gamma, beta, *, epsilon=1e-8, tm=256):
    """x: (B, S, D) float32. Returns (B, S, D) float32."""
    B, S, D = x.shape
    Din, H = w1.shape
    assert Din == D, "W1 fan-in must match in_channels"
    assert w2.shape == (H, D), "residual requires num_units[1] == in_channels"
    assert D > 1, "layer-norm with unbiased std needs at least 2 channels"
    N = B * S

    # Lane-dense channel padding (no-op when D/H are already multiples of 128).
    Dp = _round_up(D, 128)
    Hp = _round_up(H, 128)

    # Token tile: as large as requested, but never bigger than the (8-aligned)
    # token count.  Pad N up to a multiple of the tile so any B*S works.
    tm_eff = min(_round_up(N, 8), _round_up(tm, 8))
    Np = _round_up(N, tm_eff)

    x2 = jnp.pad(x.reshape(N, D), ((0, Np - N), (0, Dp - D)))
    w1p = jnp.pad(w1, ((0, Dp - D), (0, Hp - H)))
    w2p = jnp.pad(w2, ((0, Hp - H), (0, Dp - D)))
    b1p = jnp.pad(b1, (0, Hp - H)).reshape(1, Hp)
    b2p = jnp.pad(b2, (0, Dp - D)).reshape(1, Dp)
    gammap = jnp.pad(gamma, (0, Dp - D)).reshape(1, Dp)
    betap = jnp.pad(beta, (0, Dp - D)).reshape(1, Dp)

    # Explicit VMEM budget: double-buffered x/out tiles + resident weights +
    # hidden activation scratch, with headroom.  Capped at 64 MiB (v7x physical).
    est_bytes = 4 * (
        2 * 2 * tm_eff * Dp            # x + out tiles, double-buffered
        + 2 * (Dp * Hp + Hp * Dp)      # W1 + W2 (constant index -> fetched once)
        + 2 * (2 * Hp + 6 * Dp)        # biases / gamma / beta
        + tm_eff * Hp                  # hidden activation
    )
    vmem_limit = int(min(64 * 1024 * 1024, max(32 * 1024 * 1024, 2 * est_bytes)))

    kernel = functools.partial(ffn_kernel, epsilon=epsilon, feat=D, feat_pad=Dp)

    out2 = pl.pallas_call(
        kernel,
        out_shape=jax.ShapeDtypeStruct((Np, Dp), x.dtype),
        grid_spec=pltpu.PrefetchScalarGridSpec(
            num_scalar_prefetch=0,
            grid=(Np // tm_eff,),
            in_specs=[
                pl.BlockSpec((tm_eff, Dp), lambda i: (i, 0)),   # x tile
                pl.BlockSpec((Dp, Hp), lambda i: (0, 0)),       # W1 (resident)
                pl.BlockSpec((1, Hp), lambda i: (0, 0)),        # b1
                pl.BlockSpec((Hp, Dp), lambda i: (0, 0)),       # W2 (resident)
                pl.BlockSpec((1, Dp), lambda i: (0, 0)),        # b2
                pl.BlockSpec((1, Dp), lambda i: (0, 0)),        # gamma
                pl.BlockSpec((1, Dp), lambda i: (0, 0)),        # beta
            ],
            out_specs=pl.BlockSpec((tm_eff, Dp), lambda i: (i, 0)),
        ),
        compiler_params=pltpu.CompilerParams(
            dimension_semantics=("parallel",),
            vmem_limit_bytes=vmem_limit),
    )(x2, w1p, b1p, w2p, b2p, gammap, betap)

    return out2[:N, :D].reshape(B, S, D)


def feedforward_ref(x, w1, b1, w2, b2, gamma, beta, epsilon=1e-8):
    h = jnp.maximum(x @ w1 + b1, 0.0)
    y = h @ w2 + b2
    y = y + x
    mean = jnp.mean(y, axis=-1, keepdims=True)
    var = jnp.sum((y - mean) ** 2, axis=-1, keepdims=True) / (y.shape[-1] - 1)
    std = jnp.sqrt(var)
    return gamma * (y - mean) / (std + epsilon) + beta


def _make_params(key, D, H):
    k1, kb1, k2, kb2 = jax.random.split(key, 4)
    w1 = jax.random.uniform(k1, (D, H), jnp.float32, -1.0 / D ** 0.5, 1.0 / D ** 0.5)
    b1 = jax.random.uniform(kb1, (H,), jnp.float32, -1.0 / D ** 0.5, 1.0 / D ** 0.5)
    w2 = jax.random.uniform(k2, (H, D), jnp.float32, -1.0 / H ** 0.5, 1.0 / H ** 0.5)
    b2 = jax.random.uniform(kb2, (D,), jnp.float32, -1.0 / H ** 0.5, 1.0 / H ** 0.5)
    gamma = jnp.ones((D,), jnp.float32)
    beta = jnp.zeros((D,), jnp.float32)
    return w1, b1, w2, b2, gamma, beta


if __name__ == "__main__":
    key = jax.random.PRNGKey(0)

    # Test 1: small shapes consistent with the module (in_channels=32, num_units=[64, 32]).
    # Exercises the lane-padding (D=32 -> 128, H=64 -> 128) path.
    B, S, D, H = 2, 8, 32, 64
    kx, kp = jax.random.split(key)
    x = jax.random.normal(kx, (B, S, D), dtype=jnp.float32)
    params = _make_params(kp, D, H)
    out = jax.block_until_ready(feedforward_pallas(x, *params))
    ref = feedforward_ref(x, *params)
    assert out.shape == (B, S, D)
    assert jnp.allclose(out, ref, atol=1e-5, rtol=1e-5), "mismatch vs reference (small)"

    # Test 2: lane-aligned channels and a ragged token count (exercises the
    # large token tile + N-padding + multi-step grid path).
    B2, S2, D2, H2 = 4, 100, 128, 256
    kx2, kp2 = jax.random.split(jax.random.PRNGKey(1))
    x2 = jax.random.normal(kx2, (B2, S2, D2), dtype=jnp.float32)
    params2 = _make_params(kp2, D2, H2)
    out2 = jax.block_until_ready(feedforward_pallas(x2, *params2))
    ref2 = feedforward_ref(x2, *params2)
    assert out2.shape == (B2, S2, D2)
    assert jnp.allclose(out2, ref2, atol=1e-5, rtol=1e-5), "mismatch vs reference (large)"

    print("KERNEL_OK")
</pallas_src>

<mosaic_0001>
module attributes {stable_mosaic.version = 11 : i64} {
  func.func @ffn_kernel(%arg0: i32, %arg1: memref<16x128xf32, #tpu.memory_space<vmem>>, %arg2: memref<128x128xf32, #tpu.memory_space<vmem>>, %arg3: memref<1x128xf32, #tpu.memory_space<vmem>>, %arg4: memref<128x128xf32, #tpu.memory_space<vmem>>, %arg5: memref<1x128xf32, #tpu.memory_space<vmem>>, %arg6: memref<1x128xf32, #tpu.memory_space<vmem>>, %arg7: memref<1x128xf32, #tpu.memory_space<vmem>>, %arg8: memref<16x128xf32, #tpu.memory_space<vmem>>) attributes {dimension_semantics = [#tpu.dimension_semantics<parallel>], iteration_bounds = array<i64: 1>, scalar_prefetch = 0 : i64, scratch_operands = 0 : i64, tpu.core_type = #tpu.core_type<tc>, window_params = [{transform_indices = @transform_0, window_bounds = array<i64: 16, 128>}, {pipeline_mode = #tpu.pipeline_mode<synchronous>, transform_indices = @transform_1, window_bounds = array<i64: 128, 128>}, {pipeline_mode = #tpu.pipeline_mode<synchronous>, transform_indices = @transform_2, window_bounds = array<i64: 1, 128>}, {pipeline_mode = #tpu.pipeline_mode<synchronous>, transform_indices = @transform_3, window_bounds = array<i64: 128, 128>}, {pipeline_mode = #tpu.pipeline_mode<synchronous>, transform_indices = @transform_4, window_bounds = array<i64: 1, 128>}, {pipeline_mode = #tpu.pipeline_mode<synchronous>, transform_indices = @transform_5, window_bounds = array<i64: 1, 128>}, {pipeline_mode = #tpu.pipeline_mode<synchronous>, transform_indices = @transform_6, window_bounds = array<i64: 1, 128>}, {transform_indices = @transform_7, window_bounds = array<i64: 16, 128>}]} {
    %c0 = arith.constant 0 : index
    %c0_0 = arith.constant 0 : index
    %0 = vector.load %arg1[%c0, %c0_0] : memref<16x128xf32, #tpu.memory_space<vmem>>, vector<16x128xf32>
    %c0_1 = arith.constant 0 : index
    %c0_2 = arith.constant 0 : index
    %1 = vector.load %arg2[%c0_1, %c0_2] : memref<128x128xf32, #tpu.memory_space<vmem>>, vector<128x128xf32>
    %cst = arith.constant dense<0.000000e+00> : vector<16x128xf32>
    %2 = tpu.matmul %0, %1, %cst {dimension_numbers = #tpu.dot_dimension_numbers<[1], [0], [0], [1], [0, 0, 1, 1], [], []>} : vector<16x128xf32>, vector<128x128xf32>, vector<16x128xf32> -> vector<16x128xf32>
    %c0_3 = arith.constant 0 : index
    %c0_4 = arith.constant 0 : index
    %3 = vector.load %arg3[%c0_3, %c0_4] : memref<1x128xf32, #tpu.memory_space<vmem>>, vector<1x128xf32>
    %4 = vector.broadcast %3 : vector<1x128xf32> to vector<16x128xf32>
    %5 = arith.addf %2, %4 : vector<16x128xf32>
    %cst_5 = arith.constant 0.000000e+00 : f32
    %6 = vector.broadcast %cst_5 : f32 to vector<16x128xf32>
    %7 = arith.maximumf %5, %6 : vector<16x128xf32>
    %c0_6 = arith.constant 0 : index
    %c0_7 = arith.constant 0 : index
    %8 = vector.load %arg4[%c0_6, %c0_7] : memref<128x128xf32, #tpu.memory_space<vmem>>, vector<128x128xf32>
    %cst_8 = arith.constant dense<0.000000e+00> : vector<16x128xf32>
    %9 = tpu.matmul %7, %8, %cst_8 {dimension_numbers = #tpu.dot_dimension_numbers<[1], [0], [0], [1], [0, 0, 1, 1], [], []>} : vector<16x128xf32>, vector<128x128xf32>, vector<16x128xf32> -> vector<16x128xf32>
    %c0_9 = arith.constant 0 : index
    %c0_10 = arith.constant 0 : index
    %10 = vector.load %arg5[%c0_9, %c0_10] : memref<1x128xf32, #tpu.memory_space<vmem>>, vector<1x128xf32>
    %11 = vector.broadcast %10 : vector<1x128xf32> to vector<16x128xf32>
    %12 = arith.addf %9, %11 : vector<16x128xf32>
    %13 = arith.addf %12, %0 : vector<16x128xf32>
    %cst_11 = arith.constant dense<0.000000e+00> : vector<16xf32>
    %14 = vector.multi_reduction <add>, %13, %cst_11 [1] : vector<16x128xf32> to vector<16xf32>
    %15 = vector.shape_cast %14 : vector<16xf32> to vector<16x1xf32>
    %cst_12 = arith.constant 3.125000e-02 : f32
    %16 = vector.broadcast %cst_12 : f32 to vector<16x1xf32>
    %17 = arith.mulf %15, %16 : vector<16x1xf32>
    %18 = vector.broadcast %17 : vector<16x1xf32> to vector<16x128xf32>
    %19 = arith.subf %13, %18 : vector<16x128xf32>
    %20 = tpu.iota {dimensions = array<i32: 1>} : vector<1x128xi32>
    %c32_i32 = arith.constant 32 : i32
    %21 = vector.broadcast %c32_i32 : i32 to vector<1x128xi32>
    %22 = arith.cmpi slt, %20, %21 : vector<1x128xi32>
    %cst_13 = arith.constant 0.000000e+00 : f32
    %23 = vector.shape_cast %22 : vector<1x128xi1> to vector<1x128xi1>
    %24 = vector.broadcast %23 : vector<1x128xi1> to vector<16x128xi1>
    %25 = vector.broadcast %cst_13 : f32 to vector<16x128xf32>
    %26 = arith.select %24, %19, %25 : vector<16x128xi1>, vector<16x128xf32>
    %27 = arith.mulf %26, %26 : vector<16x128xf32>
    %cst_14 = arith.constant dense<0.000000e+00> : vector<16xf32>
    %28 = vector.multi_reduction <add>, %27, %cst_14 [1] : vector<16x128xf32> to vector<16xf32>
    %29 = vector.shape_cast %28 : vector<16xf32> to vector<16x1xf32>
    %cst_15 = arith.constant 0.0322580636 : f32
    %30 = vector.broadcast %cst_15 : f32 to vector<16x1xf32>
    %31 = arith.mulf %29, %30 : vector<16x1xf32>
    %32 = math.sqrt %31 : vector<16x1xf32>
    %cst_16 = arith.constant 9.99999993E-9 : f32
    %33 = vector.broadcast %cst_16 : f32 to vector<16x1xf32>
    %34 = arith.addf %32, %33 : vector<16x1xf32>
    %35 = tpu.reciprocal %34 : vector<16x1xf32> -> vector<16x1xf32>
    %c0_17 = arith.constant 0 : index
    %c0_18 = arith.constant 0 : index
    %36 = vector.load %arg6[%c0_17, %c0_18] : memref<1x128xf32, #tpu.memory_space<vmem>>, vector<1x128xf32>
    %37 = vector.broadcast %36 : vector<1x128xf32> to vector<16x128xf32>
    %38 = arith.mulf %37, %26 : vector<16x128xf32>
    %39 = vector.broadcast %35 : vector<16x1xf32> to vector<16x128xf32>
    %40 = arith.mulf %38, %39 : vector<16x128xf32>
    %c0_19 = arith.constant 0 : index
    %c0_20 = arith.constant 0 : index
    %41 = vector.load %arg7[%c0_19, %c0_20] : memref<1x128xf32, #tpu.memory_space<vmem>>, vector<1x128xf32>
    %42 = vector.broadcast %41 : vector<1x128xf32> to vector<16x128xf32>
    %43 = arith.addf %40, %42 : vector<16x128xf32>
    %c0_21 = arith.constant 0 : index
    %c0_22 = arith.constant 0 : index
    %44 = vector.load %arg8[%c0_21, %c0_22] : memref<16x128xf32, #tpu.memory_space<vmem>>, vector<16x128xf32>
    tpu.vector_store %arg8[%c0_21, %c0_22], %43 {strides = array<i32>} : memref<16x128xf32, #tpu.memory_space<vmem>>, vector<16x128xf32>,
    return
  }
  func.func @transform_0(%arg0: i32) -> (i32, i32) {
    %c0_i32 = arith.constant 0 : i32
    %c0_i32_0 = arith.constant 0 : i32
    return %arg0, %c0_i32 : i32, i32
  }
  func.func @transform_1(%arg0: i32) -> (i32, i32) {
    %c0_i32 = arith.constant 0 : i32
    %c0_i32_0 = arith.constant 0 : i32
    %c0_i32_1 = arith.constant 0 : i32
    return %c0_i32, %c0_i32_0 : i32, i32
  }
  func.func @transform_2(%arg0: i32) -> (i32, i32) {
    %c0_i32 = arith.constant 0 : i32
    %c0_i32_0 = arith.constant 0 : i32
    %c0_i32_1 = arith.constant 0 : i32
    return %c0_i32, %c0_i32_0 : i32, i32
  }
  func.func @transform_3(%arg0: i32) -> (i32, i32) {
    %c0_i32 = arith.constant 0 : i32
    %c0_i32_0 = arith.constant 0 : i32
    %c0_i32_1 = arith.constant 0 : i32
    return %c0_i32, %c0_i32_0 : i32, i32
  }
  func.func @transform_4(%arg0: i32) -> (i32, i32) {
    %c0_i32 = arith.constant 0 : i32
    %c0_i32_0 = arith.constant 0 : i32
    %c0_i32_1 = arith.constant 0 : i32
    return %c0_i32, %c0_i32_0 : i32, i32
  }
  func.func @transform_5(%arg0: i32) -> (i32, i32) {
    %c0_i32 = arith.constant 0 : i32
    %c0_i32_0 = arith.constant 0 : i32
    %c0_i32_1 = arith.constant 0 : i32
    return %c0_i32, %c0_i32_0 : i32, i32
  }
  func.func @transform_6(%arg0: i32) -> (i32, i32) {
    %c0_i32 = arith.constant 0 : i32
    %c0_i32_0 = arith.constant 0 : i32
    %c0_i32_1 = arith.constant 0 : i32
    return %c0_i32, %c0_i32_0 : i32, i32
  }
  func.func @transform_7(%arg0: i32) -> (i32, i32) {
    %c0_i32 = arith.constant 0 : i32
    %c0_i32_0 = arith.constant 0 : i32
    return %arg0, %c0_i32 : i32, i32
  }
}

</mosaic_0001>

<bundles_post_ra>
// kernel: tpu_custom_call.1
= control target key start
LH: loop header
LB: loop body
LE: loop exit
PB: predicated region body
PF: predicated region fallthrough
CT: control target
= control target key end

     0   :  { %12 = vsyncpa [#allocation3], 0  ;;  %s518_s0 = inlined_call_operand.hbm [shape: f32[16,128], index: 0, kind: input, shape index: {}]   ;;  %s519_s1 = inlined_call_operand.hbm [shape: f32[128,128], index: 1, kind: input, shape index: {}]   ;;  %s520_s2 = inlined_call_operand.vmem [shape: f32[1,128], index: 2, kind: input, shape index: {}]   ;;  %s521_s3 = inlined_call_operand.hbm [shape: f32[128,128], index: 3, kind: input, shape index: {}]   ;;  %s522_s4 = inlined_call_operand.vmem [shape: f32[1,128], index: 4, kind: input, shape index: {}]   ;;  %s523_s5 = inlined_call_operand.vmem [shape: f32[1,128], index: 5, kind: input, shape index: {}]   ;;  %s524_s6 = inlined_call_operand.vmem [shape: f32[1,128], index: 6, kind: input, shape index: {}]   ;;  %s525_s7 = inlined_call_operand.hbm [shape: f32[16,128], index: 7, kind: output, shape index: {}]  }
   0x1   :  { %13 = vsyncpa [#allocation6], 0 }
   0x2   :  { %14 = vsyncpa [#allocation4], 0  ;;  %s32_s26 = sshll.u32 %s519_s1, 4  ;;  %s431_s27 = smov [#allocation5]   ;;  %s33_s26 = int_to_ptr.hbm [resolvable:$true] %s32_s26 }
   0x3   :  { %s34_s28 = sshll.u32 %s431_s27, 4  ;;  %s19_s8 = sshll.u32 %s518_s0, 4  ;;  %s35_s28 = int_to_ptr.vmem [resolvable:$true] %s34_s28  ;;  %s20_s8 = int_to_ptr.hbm [resolvable:$true] %s19_s8 }
   0x4   :  { %s432_s9 = smov 128   ;;  %s433_s10 = smov 8  }
   0x5   :  { %40 = dma.hbm_to_vmem [thread:$0]  %s33_s26, 2048, %s35_s28, [#allocation6], %s432_s9, %s432_s9, %s433_s10  }
   0x6   :  { %s434_s11 = smov [#allocation2]   ;;  %s47_s1 = sshll.u32 %s521_s3, 4  ;;  %s48_s1 = int_to_ptr.hbm [resolvable:$true] %s47_s1 }
   0x7   :  { %s21_s12 = sshll.u32 %s434_s11, 4  ;;  %s435_s0 = smov [#allocation7]   ;;  %s22_s12 = int_to_ptr.vmem [resolvable:$true] %s21_s12 }
   0x8   :  { %27 = dma.hbm_to_vmem [thread:$0]  %s20_s8, 256, %s22_s12, [#allocation3], %s432_s9, %s432_s9, %s433_s10  }
   0x9   :  { %s49_s15 = sshll.u32 %s435_s0, 4  ;;  %s50_s15 = int_to_ptr.vmem [resolvable:$true] %s49_s15 }
   0xa   :  { %55 = dma.hbm_to_vmem [thread:$0]  %s48_s1, 2048, %s50_s15, [#allocation6], %s432_s9, %s432_s9, %s433_s10  }
   0xb   :  { %425 = dma.done.wait [#allocation3], 256  }
   0xc   :  { %426 = vsyncadd [#allocation3], 4294967040 }
   0xd   :  { %427 = dma.done.wait [#allocation6], 4096  }
   0xe   :  { %428 = vsyncadd [#allocation6], 4294963200  ;;  %v91_v0 = vld [vmem:[#allocation5 + $0x78] sm:$0xff]  ;;  %v90_v1 = vld [vmem:[#allocation5 + $0x70] sm:$0xff]  ;;  %v174_v48 = vlaneseq  ;;  %s265_s23 = sshll.u32 %s525_s7, 4  ;;  %s266_s23 = int_to_ptr.hbm [resolvable:$true] %s265_s23 }
   0xf   :  { %96 = vmatpush.msra.mxu0 %v91_v0  ;;  %279 = vmatpush.msra.mxu2 %v91_v0  ;;  %v89_v2 = vld [vmem:[#allocation5 + $0x68] sm:$0xff]  ;;  %v88_v3 = vld [vmem:[#allocation5 + $0x60] sm:$0xff]  ;;  %v87_v4 = vld [vmem:[#allocation5 + $0x58] sm:$0xff] }
  0x10   :  { %v136_v5 = vld [vmem:[#allocation7 + $0x78] sm:$0xff]  ;;  %v135_v6 = vld [vmem:[#allocation7 + $0x70] sm:$0xff]  ;;  %v134_v8 = vld [vmem:[#allocation7 + $0x68] sm:$0xff]  ;;  %v175_v49 = vand.u32 127, %v174_v48 }
  0x11   :  { %97 = vmatpush.msra.mxu0 %v90_v1  ;;  %280 = vmatpush.msra.mxu2 %v90_v1  ;;  %v86_v7 = vld [vmem:[#allocation5 + $0x50] sm:$0xff]  ;;  %v85_v9 = vld [vmem:[#allocation5 + $0x48] sm:$0xff]  ;;  %v133_v10 = vld [vmem:[#allocation7 + $0x60] sm:$0xff] }
  0x12   :  { %141 = vmatpush.msra.mxu1 %v136_v5  ;;  %295 = vmatpush.msra.mxu3 %v136_v5  ;;  %v84_v11 = vld [vmem:[#allocation5 + $0x40] sm:$0xff]  ;;  %v132_v12 = vld [vmem:[#allocation7 + $0x58] sm:$0xff]  ;;  %v131_v14 = vld [vmem:[#allocation7 + $0x50] sm:$0xff]  ;;  %vm176_vm0 = vcmp.lt.s32.totalorder %v175_v49, 32 }
  0x13   :  { %98 = vmatpush.msra.mxu0 %v89_v2  ;;  %281 = vmatpush.msra.mxu2 %v89_v2  ;;  %v83_v13 = vld [vmem:[#allocation5 + $0x38] sm:$0xff]  ;;  %v82_v15 = vld [vmem:[#allocation5 + $0x30] sm:$0xff]  ;;  %v130_v16 = vld [vmem:[#allocation7 + $0x48] sm:$0xff] }
  0x14   :  { %142 = vmatpush.msra.mxu1 %v135_v6  ;;  %296 = vmatpush.msra.mxu3 %v135_v6  ;;  %v81_v17 = vld [vmem:[#allocation5 + $0x28] sm:$0xff]  ;;  %v129_v18 = vld [vmem:[#allocation7 + $0x40] sm:$0xff]  ;;  %v128_v20 = vld [vmem:[#allocation7 + $0x38] sm:$0xff] }
  0x15   :  { %99 = vmatpush.msra.mxu0 %v88_v3  ;;  %282 = vmatpush.msra.mxu2 %v88_v3  ;;  %v80_v19 = vld [vmem:[#allocation5 + $0x20] sm:$0xff]  ;;  %v79_v21 = vld [vmem:[#allocation5 + $0x18] sm:$0xff]  ;;  %v127_v22 = vld [vmem:[#allocation7 + $0x30] sm:$0xff] }
  0x16   :  { %143 = vmatpush.msra.mxu1 %v134_v8  ;;  %297 = vmatpush.msra.mxu3 %v134_v8  ;;  %v78_v23 = vld [vmem:[#allocation5 + $0x10] sm:$0xff]  ;;  %v126_v24 = vld [vmem:[#allocation7 + $0x28] sm:$0xff]  ;;  %v125_v26 = vld [vmem:[#allocation7 + $0x20] sm:$0xff] }
  0x17   :  { %100 = vmatpush.msra.mxu0 %v87_v4  ;;  %283 = vmatpush.msra.mxu2 %v87_v4  ;;  %v77_v25 = vld [vmem:[#allocation5 + $0x8] sm:$0xff]  ;;  %v76_v27 = vld [vmem:[#allocation5] sm:$0xff]  ;;  %v74_v28 = vld [vmem:[#allocation2] sm:$0xff] }
  0x18   :  { %144 = vmatpush.msra.mxu1 %v133_v10  ;;  %298 = vmatpush.msra.mxu3 %v133_v10  ;;  %v75_v29 = vld [vmem:[#allocation2 + $0x8] sm:$0xff]  ;;  %v123_v31 = vld [vmem:[#allocation7 + $0x10] sm:$0xff]  ;;  %v122_v32 = vld [vmem:[#allocation7 + $0x8] sm:$0xff] }
  0x19   :  { %101 = vmatpush.msra.mxu0 %v86_v7  ;;  %284 = vmatpush.msra.mxu2 %v86_v7  ;;  %v124_v30 = vld [vmem:[#allocation7 + $0x18] sm:$0xff]  ;;  %v121_v33 = vld [vmem:[#allocation7] sm:$0xff]  ;;  %v317_v34 = vld [vmem:[%s520_s2] ss:$0 sm:$0xff] }
  0x1a   :  { %145 = vmatpush.msra.mxu1 %v132_v12  ;;  %299 = vmatpush.msra.mxu3 %v132_v12  ;;  %v318_v41 = vld [vmem:[%s522_s4] ss:$0 sm:$0xff] }
  0x1b   :  { %102 = vmatpush.msra.mxu0 %v85_v9  ;;  %285 = vmatpush.msra.mxu2 %v85_v9 }
  0x1c   :  { %146 = vmatpush.msra.mxu1 %v131_v14  ;;  %300 = vmatpush.msra.mxu3 %v131_v14 }
  0x1d   :  { %103 = vmatpush.msra.mxu0 %v84_v11  ;;  %286 = vmatpush.msra.mxu2 %v84_v11 }
  0x1e   :  { %147 = vmatpush.msra.mxu1 %v130_v16  ;;  %301 = vmatpush.msra.mxu3 %v130_v16 }
  0x1f   :  { %104 = vmatpush.msra.mxu0 %v83_v13  ;;  %287 = vmatpush.msra.mxu2 %v83_v13 }
  0x20   :  { %148 = vmatpush.msra.mxu1 %v129_v18  ;;  %302 = vmatpush.msra.mxu3 %v129_v18 }
  0x21   :  { %105 = vmatpush.msra.mxu0 %v82_v15  ;;  %288 = vmatpush.msra.mxu2 %v82_v15 }
  0x22   :  { %149 = vmatpush.msra.mxu1 %v128_v20  ;;  %303 = vmatpush.msra.mxu3 %v128_v20 }
  0x23   :  { %106 = vmatpush.msra.mxu0 %v81_v17  ;;  %289 = vmatpush.msra.mxu2 %v81_v17 }
  0x24   :  { %150 = vmatpush.msra.mxu1 %v127_v22  ;;  %304 = vmatpush.msra.mxu3 %v127_v22 }
  0x25   :  { %107 = vmatpush.msra.mxu0 %v80_v19  ;;  %290 = vmatpush.msra.mxu2 %v80_v19 }
  0x26   :  { %151 = vmatpush.msra.mxu1 %v126_v24  ;;  %305 = vmatpush.msra.mxu3 %v126_v24 }
  0x27   :  { %108 = vmatpush.msra.mxu0 %v79_v21  ;;  %291 = vmatpush.msra.mxu2 %v79_v21 }
  0x28   :  { %152 = vmatpush.msra.mxu1 %v125_v26  ;;  %306 = vmatpush.msra.mxu3 %v125_v26  ;;  %v319_v26 = vld [vmem:[%s523_s5] ss:$0 sm:$0xff]  ;;  %s436_s5 = smov [#allocation8]  }
  0x29   :  { %109 = vmatpush.msra.mxu0 %v78_v23  ;;  %292 = vmatpush.msra.mxu2 %v78_v23 }
  0x2a   :  { %153 = vmatpush.msra.mxu1 %v124_v30  ;;  %307 = vmatpush.msra.mxu3 %v124_v30 }
  0x2b   :  { %110 = vmatpush.msra.mxu0 %v77_v25  ;;  %293 = vmatpush.msra.mxu2 %v77_v25 }
  0x2c   :  { %154 = vmatpush.msra.mxu1 %v123_v31  ;;  %308 = vmatpush.msra.mxu3 %v123_v31 }
  0x2d   :  { %111 = vmatpush.msra.mxu0 %v76_v27  ;;  %294 = vmatpush.msra.mxu2 %v76_v27 }
  0x2e   :  { %112 = vmatmul.f32.vlgmr.msra.gmra.mxu0 %v74_v28  ;;  %115 = vmatmul.f32.vlgmr.msra.gmra.mxu2 %v75_v29 }
  0x2f   :  { %155 = vmatpush.msra.mxu1 %v122_v32  ;;  %309 = vmatpush.msra.mxu3 %v122_v32 }
  0x31   :  { %156 = vmatpush.msra.mxu1 %v121_v33  ;;  %310 = vmatpush.msra.mxu3 %v121_v33  ;;  %v320_v33 = vld [vmem:[%s524_s6] ss:$0 sm:$0xff]  ;;  %s263_s6 = sshll.u32 %s436_s5, 4  ;;  %s264_s6 = int_to_ptr.vmem [resolvable:$true] %s263_s6 }
  0xab   :  { %v113_v35 = vpop.f32.mrf.mxu0 }
  0xac   :  { %v114_v36 = vadd.f32 %v317_v34, %v113_v35 }
  0xae   :  { %v119_v37 = vmax.f32 %v114_v36, 0.0 }
  0xb0   :  { %157 = vmatmul.f32.vlgmr.msra.gmra.mxu1 %v119_v37 }
  0xb1   :  { %v116_v38 = vpop.f32.mrf.mxu2 }
  0xb2   :  { %v117_v39 = vadd.f32 %v317_v34, %v116_v38 }
  0xb4   :  { %v120_v40 = vmax.f32 %v117_v39, 0.0 }
  0xb6   :  { %160 = vmatmul.f32.vlgmr.msra.gmra.mxu3 %v120_v40 }
 0x12d   :  { %v158_v42 = vpop.f32.mrf.mxu1 }
 0x12e   :  { %v159_v43 = vadd.f32 %v318_v41, %v158_v42 }
 0x130   :  { %v164_v44 = vadd.f32 %v159_v43, %v74_v28 }
 0x132   :  { %166 = vadd.xlane.f32.xlu0 %v164_v44 }
 0x139   :  { %v161_v45 = vpop.f32.mrf.mxu3 }
 0x13a   :  { %v162_v46 = vadd.f32 %v318_v41, %v161_v45 }
 0x13c   :  { %v165_v47 = vadd.f32 %v162_v46, %v75_v29 }
 0x13e   :  { %168 = vadd.xlane.f32.xlu0 %v165_v47 }
 0x1a5   :  { %v167_v50 = vpop.xlane.xlu0 %166 }
 0x1a6   :  { %v170_v51 = vmul.f32 0.03125, %v167_v50 }
 0x1a8   :  { %v172_v52 = vsub.f32 %v164_v44, %v170_v51 }
 0x1aa   :  { %v179_v53 = vsel %vm176_vm0, %v172_v52, 0.0 }
 0x1ab   :  { %v181_v54 = vmul.f32 %v179_v53, %v179_v53  ;;  %v247_v31 = vmul.f32 %v319_v26, %v179_v53 }
 0x1ad   :  { %183 = vadd.xlane.f32.xlu1 %v181_v54 }
 0x1b1   :  { %v169_v55 = vpop.xlane.xlu0 %168 }
 0x1b2   :  { %v171_v56 = vmul.f32 0.03125, %v169_v55 }
 0x1b4   :  { %v173_v57 = vsub.f32 %v165_v47, %v171_v56 }
 0x1b6   :  { %v501_v58 = vsel %vm176_vm0, %v173_v57, 0.0 }
 0x1b7   :  { %v182_v59 = vmul.f32 %v501_v58, %v501_v58  ;;  %v248_v45 = vmul.f32 %v319_v26, %v501_v58 }
 0x1b9   :  { %185 = vadd.xlane.f32.xlu1 %v182_v59 }
 0x220   :  { %v184_v60 = vpop.xlane.xlu1 %183 }
 0x221   :  { %v187_v61 = vmul.f32 0.032258064, %v184_v60 }
 0x223   :  { %321 = vrsqrt.f32 %v187_v61  ;;  %vm196_vm1 = vcmp.eq.f32.partialorder %v187_v61, inf  ;;  %v199_v8 = vand.u32 2147483648, %v187_v61  ;;  %vm198_vm2 = vcmp.eq.f32.partialorder %v187_v61, 0.0 }
 0x229   :  { %v322_v62 = vpop.eup %321 }
 0x22a   :  { %v190_v63 = vmul.f32 %v322_v62, %v187_v61 }
 0x22c   :  { %v191_v0 = vmul.f32 %v322_v62, %v190_v63  ;;  %v186_v1 = vpop.xlane.xlu1 %185 }
 0x22d   :  { %v188_v2 = vmul.f32 0.032258064, %v186_v1 }
 0x22e   :  { %v192_v3 = vmul.f32 0.5, %v191_v0 }
 0x22f   :  { %323 = vrsqrt.f32 %v188_v2  ;;  %vm208_vm3 = vcmp.eq.f32.partialorder %v188_v2, inf  ;;  %v211_v19 = vand.u32 2147483648, %v188_v2  ;;  %vm210_vm4 = vcmp.eq.f32.partialorder %v188_v2, 0.0 }
 0x230   :  { %v193_v4 = vsub.f32 1.5, %v192_v3 }
 0x232   :  { %v194_v5 = vmul.f32 %v322_v62, %v193_v4 }
 0x234   :  { %v195_v6 = vmul.f32 %v194_v5, %v187_v61 }
 0x235   :  { %v324_v7 = vpop.eup %323 }
 0x236   :  { %v197_v9 = vsel %vm196_vm1, %v187_v61, %v195_v6  ;;  %v202_v10 = vmul.f32 %v324_v7, %v188_v2 }
 0x237   :  { %v200_v11 = vsel %vm198_vm2, %v199_v8, %v197_v9 }
 0x238   :  { %v203_v12 = vmul.f32 %v324_v7, %v202_v10  ;;  %v213_v13 = vadd.f32 1e-08, %v200_v11 }
 0x23a   :  { %v204_v14 = vmul.f32 0.5, %v203_v12  ;;  %325 = vrcp.f32 %v213_v13  ;;  %v226_v25 = vand.u32 2147483648, %v213_v13  ;;  %v224_v28 = vand.u32 2147483647, %v213_v13 }
 0x23b   :  { %vm220_vm6 = vweird.f32 %v213_v13 }
 0x23c   :  { %v205_v15 = vsub.f32 1.5, %v204_v14  ;;  %v227_v30 = vor.u32 1.1754944e-38, %v226_v25  ;;  %vm225_vm8 = vcmp.eq.f32.partialorder %v224_v28, 8.507059e+37 }
 0x23e   :  { %v206_v16 = vmul.f32 %v324_v7, %v205_v15 }
 0x240   :  { %v326_v17 = vpop.eup %325  ;;  %v207_v18 = vmul.f32 %v206_v16, %v188_v2 }
 0x241   :  { %v216_v20 = vmul.f32 %v326_v17, %v213_v13  ;;  %vm221_vm5 = vweird.f32 %v326_v17 }
 0x242   :  { %v209_v21 = vsel %vm208_vm3, %v188_v2, %v207_v18  ;;  %vm222_vm7 = vmor %vm220_vm6, %vm221_vm5 }
 0x243   :  { %v212_v22 = vsel %vm210_vm4, %v211_v19, %v209_v21  ;;  %v217_v23 = vsub.f32 1.0, %v216_v20 }
 0x244   :  { %v214_v24 = vadd.f32 1e-08, %v212_v22 }
 0x245   :  { %v218_v27 = vmul.f32 %v326_v17, %v217_v23 }
 0x246   :  { %327 = vrcp.f32 %v214_v24  ;;  %v240_v40 = vand.u32 2147483648, %v214_v24  ;;  %v238_v42 = vand.u32 2147483647, %v214_v24  ;;  %vm234_vm10 = vweird.f32 %v214_v24 }
 0x247   :  { %v219_v29 = vadd.f32 %v326_v17, %v218_v27 }
 0x248   :  { %v241_v44 = vor.u32 1.1754944e-38, %v240_v40  ;;  %vm239_vm12 = vcmp.eq.f32.partialorder %v238_v42, 8.507059e+37 }
 0x249   :  { %v223_v32 = vsel %vm222_vm7, %v326_v17, %v219_v29 }
 0x24a   :  { %v228_v34 = vsel %vm225_vm8, %v227_v30, %v223_v32 }
 0x24b   :  { %v249_v35 = vmul.f32 %v247_v31, %v228_v34 }
 0x24c   :  { %v328_v36 = vpop.eup %327 }
 0x24d   :  { %v230_v37 = vmul.f32 %v328_v36, %v214_v24  ;;  %v255_v38 = vadd.f32 %v320_v33, %v249_v35  ;;  %vm235_vm9 = vweird.f32 %v328_v36 }
 0x24e   :  { %vm236_vm11 = vmor %vm234_vm10, %vm235_vm9 }
 0x24f   :  { %v231_v39 = vsub.f32 1.0, %v230_v37  ;;  %257 = vst [vmem:[#allocation8] sm:$0xff] %v255_v38 }
 0x251   :  { %v232_v41 = vmul.f32 %v328_v36, %v231_v39 }
 0x253   :  { %v233_v43 = vadd.f32 %v328_v36, %v232_v41 }
 0x255   :  { %v237_v46 = vsel %vm236_vm11, %v328_v36, %v233_v43 }
 0x256   :  { %v242_v47 = vsel %vm239_vm12, %v241_v44, %v237_v46 }
 0x257   :  { %v250_v48 = vmul.f32 %v248_v45, %v242_v47 }
 0x259   :  { %v256_v49 = vadd.f32 %v320_v33, %v250_v48 }
 0x25b   :  { %258 = vst [vmem:[#allocation8 + $0x8] sm:$0xff] %v256_v49 }
 0x25c   :  { %271 = dma.vmem_to_hbm [thread:$0]  %s264_s6, 256, %s266_s23, [#allocation4], %s432_s9, %s432_s9, %s433_s10  }
 0x25d   :  { %429 = dma.done.wait [#allocation4], 256  }
 0x25e   :  { %430 = vsyncadd [#allocation4], 4294967040 }
 0x25f   :  { %276 = vsyncpa [#allocation3], 1 }
 0x260   :  { %277 = vsyncpa [#allocation6], 1 }
 0x261   :  { %278 = vsyncpa [#allocation4], 1 }

</bundles_post_ra>
